<compile_context>
chip_gen: v5e
topology: v5e:2x2
jax: 0.10.0
libtpu: 0.0.40
codegen_flags: <defaults>
</compile_context>

<pallas_src>
import jax
import jax.numpy as jnp
from jax.experimental import pallas as pl
from jax.experimental.pallas import tpu as pltpu


def _convblock_kernel(p_ref, w_ref, b_ref, o_ref):
    # p_ref: (1, K^3*Cin, DHW) bf16  -- im2col patches for one batch element
    # w_ref: (Cout, K^3*Cin)   bf16  -- conv weights, matching patch ordering
    # b_ref: (Cout, 1)         f32   -- conv bias
    # o_ref: (1, Cout, DHW)    f32   -- normalized activations
    # Single MXU matmul, f32 accumulation. (Cout, KC) x (KC, DHW) -> (Cout, DHW)
    y = jnp.dot(w_ref[...], p_ref[0], preferred_element_type=jnp.float32)

    # bias + LeakyReLU(0.2) (f32 VPU, lane-dense)
    y = y + b_ref[...]
    y = jnp.where(y >= 0, y, jnp.float32(0.2) * y)

    # InstanceNorm3d (affine=False, eps=1e-5): per-channel stats over DHW (lane axis),
    # single pass: var = E[y^2] - mean^2 (kept in f32).
    dhw = y.shape[1]
    inv_n = jnp.float32(1.0 / dhw)
    mean = jnp.sum(y, axis=1, keepdims=True) * inv_n           # (Cout, 1)
    ex2 = jnp.sum(y * y, axis=1, keepdims=True) * inv_n        # (Cout, 1)
    var = jnp.maximum(ex2 - mean * mean, jnp.float32(0.0))

    o_ref[0] = (y - mean) * jax.lax.rsqrt(var + jnp.float32(1e-5))


def conv_block(x_ncdhw, weight_oidhw, bias, kernel_size,
               compute_dtype=jnp.bfloat16):
    """Pallas ConvBlock forward.

    x_ncdhw:      (N, Cin, D, H, W) float32  (PyTorch NCDHW)
    weight_oidhw: (Cout, Cin, K, K, K)       (PyTorch Conv3d weight layout)
    bias:         (Cout,)
    """
    assert kernel_size % 2 == 1, "padding='same' implemented for odd kernel sizes"
    N, Cin, D, H, W = x_ncdhw.shape
    K = kernel_size
    pad = K // 2
    Cout = weight_oidhw.shape[0]
    DHW = D * H * W
    KC = K * K * K * Cin

    # 'same' padding folded into the patch extraction (one wrapper-side pass).
    xp = jnp.pad(x_ncdhw.astype(jnp.float32),
                 ((0, 0), (0, 0), (pad, pad), (pad, pad), (pad, pad)))

    # im2col: (N, K^3*Cin, D*H*W); patch-channel ordering = (kd, kh, kw, cin), cin fastest.
    cols = []
    for kd in range(K):
        for kh in range(K):
            for kw in range(K):
                cols.append(
                    xp[:, :, kd:kd + D, kh:kh + H, kw:kw + W].reshape(N, Cin, DHW))
    patches = jnp.concatenate(cols, axis=1).astype(compute_dtype)          # (N, KC, DHW)

    # Weights: OIDHW -> (Cout, Kd, Kh, Kw, Cin) -> (Cout, K^3*Cin) to match the patches.
    w2 = jnp.transpose(weight_oidhw, (0, 2, 3, 4, 1)).reshape(Cout, KC)
    w2 = w2.astype(compute_dtype)
    b2 = bias.reshape(Cout, 1).astype(jnp.float32)

    out = pl.pallas_call(
        _convblock_kernel,
        out_shape=jax.ShapeDtypeStruct((N, Cout, DHW), jnp.float32),
        grid_spec=pltpu.PrefetchScalarGridSpec(
            num_scalar_prefetch=0,
            grid=(N,),
            in_specs=[
                pl.BlockSpec((1, KC, DHW), lambda n: (n, 0, 0)),
                pl.BlockSpec((Cout, KC), lambda n: (0, 0)),
                pl.BlockSpec((Cout, 1), lambda n: (0, 0)),
            ],
            out_specs=pl.BlockSpec((1, Cout, DHW), lambda n: (n, 0, 0)),
        ),
        compiler_params=pltpu.CompilerParams(
            dimension_semantics=("parallel",),
            vmem_limit_bytes=32 * 1024 * 1024,
        ),
    )(patches, w2, b2)

    # (N, Cout, DHW) -> (N, Cout, D, H, W): contiguous reshape, no transpose needed.
    return out.reshape(N, Cout, D, H, W)


def conv_block_ref(x_ncdhw, weight_oidhw, bias, compute_dtype=jnp.bfloat16):
    """Pure-JAX reference (same bf16 matmul precision, f32 accumulation)."""
    y = jax.lax.conv_general_dilated(
        x_ncdhw.astype(compute_dtype), weight_oidhw.astype(compute_dtype),
        window_strides=(1, 1, 1), padding="SAME",
        dimension_numbers=("NCDHW", "OIDHW", "NCDHW"),
        preferred_element_type=jnp.float32)
    y = y + bias.reshape(1, -1, 1, 1, 1).astype(jnp.float32)
    y = jnp.where(y >= 0, y, 0.2 * y)
    mean = jnp.mean(y, axis=(2, 3, 4), keepdims=True)
    var = jnp.mean((y - mean) ** 2, axis=(2, 3, 4), keepdims=True)
    return (y - mean) * jax.lax.rsqrt(var + 1e-5)


if __name__ == "__main__":
    # ConvBlock(in_channels=4, out_channels=8, kernel_size=3) on a small volume.
    N, Cin, Cout, D, H, W, K = 2, 4, 8, 8, 8, 8, 3

    key = jax.random.PRNGKey(0)
    kx, kw, kb = jax.random.split(key, 3)

    x = jax.random.normal(kx, (N, Cin, D, H, W), dtype=jnp.float32)
    fan_in = Cin * K * K * K
    weight_oidhw = jax.random.normal(
        kw, (Cout, Cin, K, K, K), dtype=jnp.float32) / jnp.sqrt(fan_in)
    bias = jax.random.normal(kb, (Cout,), dtype=jnp.float32) * 0.1

    out = conv_block(x, weight_oidhw, bias, K)
    out = jax.block_until_ready(out)

    ref = conv_block_ref(x, weight_oidhw, bias)
    assert out.shape == (N, Cout, D, H, W)
    err = float(jnp.max(jnp.abs(out - ref)))
    assert jnp.allclose(out, ref, atol=2e-3, rtol=2e-3), err

    print("KERNEL_OK")
</pallas_src>

<mosaic_0001>
module attributes {stable_mosaic.version = 11 : i64} {
  func.func @_convblock_kernel(%arg0: i32, %arg1: memref<1x108x512xbf16, #tpu.memory_space<vmem>>, %arg2: memref<8x108xbf16, #tpu.memory_space<vmem>>, %arg3: memref<8x1xf32, #tpu.memory_space<vmem>>, %arg4: memref<1x8x512xf32, #tpu.memory_space<vmem>>) attributes {dimension_semantics = [#tpu.dimension_semantics<parallel>], iteration_bounds = array<i64: 2>, scalar_prefetch = 0 : i64, scratch_operands = 0 : i64, tpu.core_type = #tpu.core_type<tc>, window_params = [{transform_indices = @transform_0, window_bounds = array<i64: 1, 108, 512>}, {pipeline_mode = #tpu.pipeline_mode<synchronous>, transform_indices = @transform_1, window_bounds = array<i64: 8, 108>}, {pipeline_mode = #tpu.pipeline_mode<synchronous>, transform_indices = @transform_2, window_bounds = array<i64: 8, 1>}, {transform_indices = @transform_3, window_bounds = array<i64: 1, 8, 512>}]} {
    %c0 = arith.constant 0 : index
    %c0_0 = arith.constant 0 : index
    %0 = vector.load %arg2[%c0, %c0_0] : memref<8x108xbf16, #tpu.memory_space<vmem>>, vector<8x108xbf16>
    %c0_1 = arith.constant 0 : index
    %c0_2 = arith.constant 0 : index
    %c0_3 = arith.constant 0 : index
    %1 = vector.load %arg1[%c0_1, %c0_2, %c0_3] : memref<1x108x512xbf16, #tpu.memory_space<vmem>>, vector<1x108x512xbf16>
    %2 = vector.shape_cast %1 : vector<1x108x512xbf16> to vector<108x512xbf16>
    %cst = arith.constant dense<0.000000e+00> : vector<8x512xf32>
    %3 = tpu.matmul %0, %2, %cst {dimension_numbers = #tpu.dot_dimension_numbers<[1], [0], [0], [1], [0, 0, 1, 1], [], []>} : vector<8x108xbf16>, vector<108x512xbf16>, vector<8x512xf32> -> vector<8x512xf32>
    %c0_4 = arith.constant 0 : index
    %c0_5 = arith.constant 0 : index
    %4 = vector.load %arg3[%c0_4, %c0_5] : memref<8x1xf32, #tpu.memory_space<vmem>>, vector<8x1xf32>
    %5 = vector.broadcast %4 : vector<8x1xf32> to vector<8x512xf32>
    %6 = arith.addf %3, %5 : vector<8x512xf32>
    %cst_6 = arith.constant 0.000000e+00 : f32
    %7 = vector.broadcast %cst_6 : f32 to vector<8x512xf32>
    %8 = arith.cmpf oge, %6, %7 : vector<8x512xf32>
    %cst_7 = arith.constant 2.000000e-01 : f32
    %9 = vector.broadcast %cst_7 : f32 to vector<8x512xf32>
    %10 = arith.mulf %9, %6 : vector<8x512xf32>
    %11 = arith.select %8, %6, %10 : vector<8x512xi1>, vector<8x512xf32>
    %cst_8 = arith.constant dense<0.000000e+00> : vector<8xf32>
    %12 = vector.multi_reduction <add>, %11, %cst_8 [1] : vector<8x512xf32> to vector<8xf32>
    %13 = vector.shape_cast %12 : vector<8xf32> to vector<8x1xf32>
    %cst_9 = arith.constant 0.001953125 : f32
    %14 = vector.broadcast %cst_9 : f32 to vector<8x1xf32>
    %15 = arith.mulf %13, %14 : vector<8x1xf32>
    %16 = arith.mulf %11, %11 : vector<8x512xf32>
    %cst_10 = arith.constant dense<0.000000e+00> : vector<8xf32>
    %17 = vector.multi_reduction <add>, %16, %cst_10 [1] : vector<8x512xf32> to vector<8xf32>
    %18 = vector.shape_cast %17 : vector<8xf32> to vector<8x1xf32>
    %cst_11 = arith.constant 0.001953125 : f32
    %19 = vector.broadcast %cst_11 : f32 to vector<8x1xf32>
    %20 = arith.mulf %18, %19 : vector<8x1xf32>
    %21 = arith.mulf %15, %15 : vector<8x1xf32>
    %22 = arith.subf %20, %21 : vector<8x1xf32>
    %cst_12 = arith.constant 0.000000e+00 : f32
    %23 = vector.broadcast %cst_12 : f32 to vector<8x1xf32>
    %24 = arith.maximumf %22, %23 : vector<8x1xf32>
    %25 = vector.broadcast %15 : vector<8x1xf32> to vector<8x512xf32>
    %26 = arith.subf %11, %25 : vector<8x512xf32>
    %cst_13 = arith.constant 9.99999974E-6 : f32
    %27 = vector.broadcast %cst_13 : f32 to vector<8x1xf32>
    %28 = arith.addf %24, %27 : vector<8x1xf32>
    %29 = math.rsqrt %28 : vector<8x1xf32>
    %30 = vector.broadcast %29 : vector<8x1xf32> to vector<8x512xf32>
    %31 = arith.mulf %26, %30 : vector<8x512xf32>
    %c0_14 = arith.constant 0 : index
    %c0_15 = arith.constant 0 : index
    %c0_16 = arith.constant 0 : index
    %32 = vector.load %arg4[%c0_14, %c0_15, %c0_16] : memref<1x8x512xf32, #tpu.memory_space<vmem>>, vector<1x8x512xf32>
    %33 = vector.shape_cast %32 : vector<1x8x512xf32> to vector<8x512xf32>
    %34 = vector.shape_cast %31 : vector<8x512xf32> to vector<1x8x512xf32>
    tpu.vector_store %arg4[%c0_14, %c0_15, %c0_16], %34 {strides = array<i32>} : memref<1x8x512xf32, #tpu.memory_space<vmem>>, vector<1x8x512xf32>,
    return
  }
  func.func @transform_0(%arg0: i32) -> (i32, i32, i32) {
    %c0_i32 = arith.constant 0 : i32
    %c0_i32_0 = arith.constant 0 : i32
    %c0_i32_1 = arith.constant 0 : i32
    return %arg0, %c0_i32, %c0_i32_0 : i32, i32, i32
  }
  func.func @transform_1(%arg0: i32) -> (i32, i32) {
    %c0_i32 = arith.constant 0 : i32
    %c0_i32_0 = arith.constant 0 : i32
    %c0_i32_1 = arith.constant 0 : i32
    return %c0_i32, %c0_i32_0 : i32, i32
  }
  func.func @transform_2(%arg0: i32) -> (i32, i32) {
    %c0_i32 = arith.constant 0 : i32
    %c0_i32_0 = arith.constant 0 : i32
    %c0_i32_1 = arith.constant 0 : i32
    return %c0_i32, %c0_i32_0 : i32, i32
  }
  func.func @transform_3(%arg0: i32) -> (i32, i32, i32) {
    %c0_i32 = arith.constant 0 : i32
    %c0_i32_0 = arith.constant 0 : i32
    %c0_i32_1 = arith.constant 0 : i32
    return %arg0, %c0_i32, %c0_i32_0 : i32, i32, i32
  }
}

</mosaic_0001>

<bundles_post_ra>
// kernel: tpu_custom_call.1
= control target key start
LH: loop header
LB: loop body
LE: loop exit
PB: predicated region body
PF: predicated region fallthrough
CT: control target
= control target key end

     0   :  { %8 = vsyncpa [#allocation3], 0  ;;  %s978_s0 = inlined_call_operand.vmem [shape: bf16[2,108,512], index: 0, kind: input, shape index: {}]   ;;  %s979_s1 = inlined_call_operand.vmem [shape: bf16[8,108], index: 1, kind: input, shape index: {}]   ;;  %s980_s2 = inlined_call_operand.vmem [shape: f32[8,1], index: 2, kind: input, shape index: {}]   ;;  %s981_s3 = inlined_call_operand.hbm [shape: f32[2,8,512], index: 3, kind: output, shape index: {}]  }
   0x1   :  { %10 = vsyncpa [#allocation3 + $0x1], 0  ;;  %s825_s12 = smov 0   ;;  %s827_s13 = smov 0  }
   0x2   :  { %s829_s14 = smov 0   ;;  %s831_s15 = smov 0  }
   0x3 LB: > { %s846_s16 = sadd.s32 4294967295, %s802_s15   ;;  %s540_s17 = sadd.s32 4294967294, %s802_s15   ;;  %s802_s15 = sphi %s831_s15, %s987_s15   ;;  %s798_s14 = sphi %s829_s14, %s986_s14   ;;  %s794_s13 = sphi %s827_s13, %s985_s13   ;;  %s790_s12 = sphi %s825_s12, %s984_s12  }
   0x4   : > { %s850_s18 = sadd.s32 1, %s802_s15   ;;  %s91_s19 = sadd.s32 1, %s798_s14 }
   0x5   : > { %s88_s20 = ssub.s32 %s802_s15, %s850_s18  ;;  %p101_p0 = scmp.ne.s32.totalorder %s798_s14, %s794_s13 }
   0x6   : > { %p89_p1 = scmp.eq.s32.totalorder %s88_s20, 0  ;;  %p102_p2 = scmp.eq.s32.totalorder %s846_s16, 1 }
   0x7   : > { %p107_p3 = scmp.ne.s32.totalorder %s794_s13, %s790_s12  ;;  %p108_p4 = scmp.eq.s32.totalorder %s540_s17, 1 }
   0x8   : > { %s861_s21 = scalar_select %p89_p1, %s798_s14, %s91_s19  }
   0x9   : > { %p863_p5 = por %p102_p2, %p101_p0  ;;  %p867_p6 = por %p108_p4, %p107_p3 }
   0xa   : > { %p543_p7 = scmp.ge.s32.totalorder %s802_s15, 1  ;;  %p140_p8 = scmp.lt.s32.totalorder %s802_s15, 3 }
   0xc   : > { %p141_p9 = pnand %p543_p7, %p140_p8 }
   0xd   : > { %p164_p10 = scmp.lt.s32.totalorder (!%p141_p9), %s846_s16, 1  ;;  %s161_s6 = sand.u32 (!%p141_p9), 1, %s794_s13  }
   0xe   : > { %144 = sbr.rel (%p141_p9) target bundleno = 349 (0x15d), region = 32  ;;  %s544_s7 = sshll.u32 (!%p141_p9), %s161_s6, 5 }
   0xf   : > { %s695_s8 = sshll.u32 (!%p141_p9), %s846_s16, 5  ;;  %s163_s17 = scalar_lea.vmem (!%p141_p9), [#allocation2], %s544_s7 }
  0x10   : > { %s476_s11 = scalar_lea.hbm (!%p141_p9), %s981_s3, %s695_s8  ;;  %s465_s20 = scalar_lea.sflag (!%p141_p9), [#allocation3], %s161_s6 }
  0x11   : > { %s480_s19 = sshll.u32 (!%p141_p9), %s476_s11, 4  ;;  %s481_s19 = int_to_ptr.hbm [resolvable:$true] %s480_s19 }
  0x13   : > { %s165_s24 = scalar_select %p164_p10, %s846_s16, 1  ;;  %vm345_vm0 = vcmask 1045504   ;;  %v804_v21 = vmov 0   ;;  %v199_v26 = vld [vmem:[%s980_s2] sm:$0xff]  ;;  %vm341_vm1 = vcmask 883712  }
  0x14   : > { %737 = vset.pattern.permute.xlu0 %v804_v21  ;;  %s478_s16 = sshll.u32 %s163_s17, 4  ;;  %s479_s16 = int_to_ptr.vmem [resolvable:$true] %s478_s16 }
  0x15   : > { %s696_s25 = smul.u32 224, %s165_s24  ;;  %202 = vperm.xlu0 %737, %v199_v26   ;;  %v170_v26 = vld [vmem:[%s979_s1] sm:$0xf]  ;;  %s754_s24 = sshra.s32 %s481_s19, 4  ;;  %s755_s24 = int_to_ptr.hbm [resolvable:$true] %s754_s24 }
  0x16   : > { %p761_p0 = scmp.lt.s32.totalorder %s755_s24, %s981_s3 }
  0x17   : > { %s878_s28 = scalar_lea.vmem %s978_s0, %s696_s25  ;;  %s756_s25 = scalar_lea.hbm %s755_s24, 32 }
  0x18   : > { %v644_v0 = vld [vmem:[%s878_s28 + $0xc0] sm:$0xf]  ;;  %v693_v1 = vld [vmem:[%s878_s28 + $0xcc] sm:$0x30]  ;;  %v691_v2 = vld [vmem:[%s878_s28 + $0xc4] sm:$0xf]  ;;  %p757_p11 = scmp.ne.s32.totalorder %s755_s24, %s756_s25 }
  0x19   : > { %v645_v3 = vor.u32 %v693_v1, %v644_v0  ;;  %v646_v4 = vld [vmem:[%s878_s28 + $0xd0] sm:$0x30]  ;;  %v652_v5 = vld [vmem:[%s878_s28 + $0xc8] sm:$0xf]  ;;  %v694_v6 = vld [vmem:[%s878_s28 + $0xd4] sm:$0x30] }
  0x1a   : > { %v649_v7 = vor.u32 %v691_v2, %v646_v4  ;;  %v653_v8 = vor.u32 %v694_v6, %v652_v5  ;;  %v692_v9 = vld [vmem:[%s878_s28 + $0xcc] sm:$0xf]  ;;  %v654_v10 = vld [vmem:[%s878_s28 + $0xd8] sm:$0x30]  ;;  %v628_v11 = vld [vmem:[%s878_s28 + $0xa0] sm:$0xf]  ;;  %p758_p12 = pnand %p757_p11, %p863_p5 }
  0x1b   : > { %v347_v12 = vsel %vm345_vm0, %v645_v3, 0  ;;  %v657_v13 = vor.u32 %v692_v9, %v654_v10  ;;  %v689_v14 = vld [vmem:[%s878_s28 + $0xac] sm:$0xf0]  ;;  %v687_v15 = vld [vmem:[%s878_s28 + $0xa4] sm:$0xf] }
  0x1c   : > { %359 = vmatpush.bf16.msra.mxu0 %v347_v12  ;;  %v350_v16 = vsel %vm345_vm0, %v649_v7, 0  ;;  %v353_v17 = vsel %vm345_vm0, %v653_v8, 0  ;;  %v629_v18 = vor.u32 %v689_v14, %v628_v11  ;;  %v630_v19 = vld [vmem:[%s878_s28 + $0xb0] sm:$0xf0]  ;;  %v636_v20 = vld [vmem:[%s878_s28 + $0xa8] sm:$0xf]  ;;  %p759_p13 = pneg %p758_p12 }
  0x1d   : > { %372 = vmatpush.bf16.msra.mxu1 %v350_v16  ;;  %385 = vmatpush.bf16.msra.mxu2 %v353_v17  ;;  %v356_v22 = vsel %vm345_vm0, %v657_v13, 0  ;;  %v633_v23 = vor.u32 %v687_v15, %v630_v19  ;;  %v690_v24 = vld [vmem:[%s878_s28 + $0xb4] sm:$0xf0]  ;;  %v688_v25 = vld [vmem:[%s878_s28 + $0xac] sm:$0xf] }
  0x1e   : > { %398 = vmatpush.bf16.msra.mxu3 %v356_v22  ;;  %v637_v27 = vor.u32 %v690_v24, %v636_v20  ;;  %v638_v28 = vld [vmem:[%s878_s28 + $0xb8] sm:$0xf0]  ;;  %v612_v29 = vld [vmem:[%s878_s28 + $0x80] sm:$0xf]  ;;  %v685_v30 = vld [vmem:[%s878_s28 + $0x8c] sm:$0xf0] }
  0x1f   : > { %v641_v31 = vor.u32 %v688_v25, %v638_v28  ;;  %v683_v32 = vld [vmem:[%s878_s28 + $0x84] sm:$0xf]  ;;  %v614_v33 = vld [vmem:[%s878_s28 + $0x90] sm:$0xf0]  ;;  %v620_v34 = vld [vmem:[%s878_s28 + $0x88] sm:$0xf]  ;;  %v613_v35 = vor.u32 %v685_v30, %v612_v29 }
  0x20   : > { %360 = vmatpush.bf16.msra.mxu0 %v629_v18  ;;  %v686_v36 = vld [vmem:[%s878_s28 + $0x94] sm:$0xf0]  ;;  %v684_v37 = vld [vmem:[%s878_s28 + $0x8c] sm:$0xf]  ;;  %v622_v38 = vld [vmem:[%s878_s28 + $0x98] sm:$0xf0]  ;;  %v617_v39 = vor.u32 %v683_v32, %v614_v33 }
  0x21   : > { %373 = vmatpush.bf16.msra.mxu1 %v633_v23  ;;  %386 = vmatpush.bf16.msra.mxu2 %v637_v27  ;;  %v621_v40 = vor.u32 %v686_v36, %v620_v34  ;;  %v596_v41 = vld [vmem:[%s878_s28 + $0x60] sm:$0xf]  ;;  %v681_v42 = vld [vmem:[%s878_s28 + $0x6c] sm:$0xf0]  ;;  %v679_v43 = vld [vmem:[%s878_s28 + $0x64] sm:$0xf]  ;;  %v625_v44 = vor.u32 %v684_v37, %v622_v38 }
  0x22   : > { %399 = vmatpush.bf16.msra.mxu3 %v641_v31  ;;  %v598_v45 = vld [vmem:[%s878_s28 + $0x70] sm:$0xf0]  ;;  %v604_v46 = vld [vmem:[%s878_s28 + $0x68] sm:$0xf]  ;;  %v682_v47 = vld [vmem:[%s878_s28 + $0x74] sm:$0xf0]  ;;  %v597_v50 = vor.u32 %v681_v42, %v596_v41 }
  0x23   : > { %v680_v48 = vld [vmem:[%s878_s28 + $0x6c] sm:$0xf]  ;;  %v606_v49 = vld [vmem:[%s878_s28 + $0x78] sm:$0xf0]  ;;  %v601_v51 = vor.u32 %v679_v43, %v598_v45  ;;  %v605_v52 = vor.u32 %v682_v47, %v604_v46  ;;  %v580_v53 = vld [vmem:[%s878_s28 + $0x40] sm:$0xf] }
  0x24   : > { %361 = vmatpush.bf16.msra.mxu0 %v613_v35  ;;  %v677_v54 = vld [vmem:[%s878_s28 + $0x4c] sm:$0xf0]  ;;  %v675_v55 = vld [vmem:[%s878_s28 + $0x44] sm:$0xf]  ;;  %v609_v56 = vor.u32 %v680_v48, %v606_v49  ;;  %v582_v57 = vld [vmem:[%s878_s28 + $0x50] sm:$0xf0] }
  0x25   : > { %374 = vmatpush.bf16.msra.mxu1 %v617_v39  ;;  %387 = vmatpush.bf16.msra.mxu2 %v621_v40  ;;  %v588_v58 = vld [vmem:[%s878_s28 + $0x48] sm:$0xf]  ;;  %v678_v59 = vld [vmem:[%s878_s28 + $0x54] sm:$0xf0]  ;;  %v676_v60 = vld [vmem:[%s878_s28 + $0x4c] sm:$0xf]  ;;  %v581_v62 = vor.u32 %v677_v54, %v580_v53  ;;  %v585_v63 = vor.u32 %v675_v55, %v582_v57 }
  0x26   : > { %400 = vmatpush.bf16.msra.mxu3 %v625_v44  ;;  %v590_v61 = vld [vmem:[%s878_s28 + $0x58] sm:$0xf0]  ;;  %v589_v0 = vor.u32 %v678_v59, %v588_v58  ;;  %v564_v1 = vld [vmem:[%s878_s28 + $0x20] sm:$0xf]  ;;  %v673_v2 = vld [vmem:[%s878_s28 + $0x2c] sm:$0xf0] }
  0x27   : > { %v671_v3 = vld [vmem:[%s878_s28 + $0x24] sm:$0xf]  ;;  %v593_v4 = vor.u32 %v676_v60, %v590_v61  ;;  %v566_v5 = vld [vmem:[%s878_s28 + $0x30] sm:$0xf0]  ;;  %v572_v6 = vld [vmem:[%s878_s28 + $0x28] sm:$0xf]  ;;  %v565_v10 = vor.u32 %v673_v2, %v564_v1 }
  0x28   : > { %362 = vmatpush.bf16.msra.mxu0 %v597_v50  ;;  %v674_v7 = vld [vmem:[%s878_s28 + $0x34] sm:$0xf0]  ;;  %v672_v8 = vld [vmem:[%s878_s28 + $0x2c] sm:$0xf]  ;;  %v574_v9 = vld [vmem:[%s878_s28 + $0x38] sm:$0xf0]  ;;  %v569_v11 = vor.u32 %v671_v3, %v566_v5 }
  0x29   : > { %375 = vmatpush.bf16.msra.mxu1 %v601_v51  ;;  %388 = vmatpush.bf16.msra.mxu2 %v605_v52  ;;  %v573_v12 = vor.u32 %v674_v7, %v572_v6  ;;  %v548_v13 = vld [vmem:[%s878_s28] sm:$0xf]  ;;  %v669_v14 = vld [vmem:[%s878_s28 + $0xc] sm:$0xf0]  ;;  %v667_v15 = vld [vmem:[%s878_s28 + $0x4] sm:$0xf]  ;;  %v577_v16 = vor.u32 %v672_v8, %v574_v9 }
  0x2a   : > { %401 = vmatpush.bf16.msra.mxu3 %v609_v56  ;;  %v550_v17 = vld [vmem:[%s878_s28 + $0x10] sm:$0xf0]  ;;  %v556_v18 = vld [vmem:[%s878_s28 + $0x8] sm:$0xf]  ;;  %v670_v19 = vld [vmem:[%s878_s28 + $0x14] sm:$0xf0]  ;;  %v549_v22 = vor.u32 %v669_v14, %v548_v13 }
  0x2b   : > { %v668_v20 = vld [vmem:[%s878_s28 + $0xc] sm:$0xf]  ;;  %v558_v21 = vld [vmem:[%s878_s28 + $0x18] sm:$0xf0]  ;;  %v553_v23 = vor.u32 %v667_v15, %v550_v17  ;;  %v557_v24 = vor.u32 %v670_v19, %v556_v18  ;;  %s760_s28 = scalar_lea.hbm %s981_s3, 64 }
  0x2c   : > { %363 = vmatpush.bf16.msra.mxu0 %v581_v62  ;;  %v561_v25 = vor.u32 %v668_v20, %v558_v21  ;;  %p762_p1 = scmp.lt.s32.totalorder %s760_s28, %s756_s25 }
  0x2d   : > { %376 = vmatpush.bf16.msra.mxu1 %v585_v63  ;;  %389 = vmatpush.bf16.msra.mxu2 %v589_v0 }
  0x2e   : > { %402 = vmatpush.bf16.msra.mxu3 %v593_v4  ;;  %p763_p2 = por %p762_p1, %p761_p0 }
  0x30   : > { %364 = vmatpush.bf16.msra.mxu0 %v565_v10  ;;  %p764_p3 = pnand %p763_p2, %p759_p13 }
  0x31   : > { %377 = vmatpush.bf16.msra.mxu1 %v569_v11  ;;  %390 = vmatpush.bf16.msra.mxu2 %v573_v12 }
  0x32   : > { %403 = vmatpush.bf16.msra.mxu3 %v577_v16 }
  0x34   : > { %365 = vmatpush.bf16.msra.mxu0 %v549_v22 }
  0x35   : > { %378 = vmatpush.bf16.msra.mxu1 %v553_v23  ;;  %391 = vmatpush.bf16.msra.mxu2 %v557_v24 }
  0x36   : > { %404 = vmatpush.bf16.msra.mxu3 %v561_v25 }
  0x37   : > { %658 = vmatmul.msk.bf16.vlgmr.msra.gmra.mxu0 %vm341_vm1, %v170_v26 }
  0x38   : > { %659 = vmatmul.msk.bf16.vlgmr.msra.gmra.mxu1 %vm341_vm1, %v170_v26  ;;  %660 = vmatmul.msk.bf16.vlgmr.msra.gmra.mxu2 %vm341_vm1, %v170_v26 }
  0x39   : > { %661 = vmatmul.msk.bf16.vlgmr.msra.gmra.mxu3 %vm341_vm1, %v170_v26 }
  0x87   : > { %v203_v27 = vpop.permute.xlu0 %202 }
  0xb4   : > { %v367_v28 = vpop.f32.mrf.mxu0 }
  0xb5   : > { %v380_v29 = vpop.f32.mrf.mxu1  ;;  %v368_v30 = vadd.f32 %v367_v28, %v203_v27 }
  0xb6   : > { %v381_v31 = vadd.f32 %v380_v29, %v203_v27 }
  0xb7   : > { %v414_v32 = vmul.f32 0.2, %v368_v30  ;;  %vm410_vm2 = vcmp.ge.f32.partialorder %v368_v30, 0.0 }
  0xb8   : > { %v415_v33 = vmul.f32 0.2, %v381_v31  ;;  %vm411_vm3 = vcmp.ge.f32.partialorder %v381_v31, 0.0 }
  0xb9   : > { %v418_v34 = vsel %vm410_vm2, %v368_v30, %v414_v32 }
  0xba   : > { %v419_v35 = vsel %vm411_vm3, %v381_v31, %v415_v33  ;;  %v428_v42 = vmul.f32 %v418_v34, %v418_v34 }
  0xbb   : > { %v393_v36 = vpop.f32.mrf.mxu2  ;;  %v429_v43 = vmul.f32 %v419_v35, %v419_v35  ;;  %v422_v46 = vadd.f32 %v419_v35, %v418_v34 }
  0xbc   : > { %v394_v37 = vadd.f32 %v393_v36, %v203_v27  ;;  %v406_v38 = vpop.f32.mrf.mxu3  ;;  %v369_v39 = vpop.f32.mrf.mxu0 }
  0xbd   : > { %v407_v40 = vadd.f32 %v406_v38, %v203_v27  ;;  %v382_v41 = vpop.f32.mrf.mxu1  ;;  %v432_v51 = vadd.f32 %v429_v43, %v428_v42 }
  0xbe   : > { %vm412_vm4 = vcmp.ge.f32.partialorder %v394_v37, 0.0  ;;  %v416_v44 = vmul.f32 0.2, %v394_v37 }
  0xbf   : > { %vm413_vm5 = vcmp.ge.f32.partialorder %v407_v40, 0.0  ;;  %v417_v45 = vmul.f32 0.2, %v407_v40 }
  0xc0   : > { %v420_v47 = vsel %vm412_vm4, %v394_v37, %v416_v44 }
  0xc1   : > { %v421_v48 = vsel %vm413_vm5, %v407_v40, %v417_v45  ;;  %v423_v49 = vadd.f32 %v422_v46, %v420_v47  ;;  %v430_v50 = vmul.f32 %v420_v47, %v420_v47 }
  0xc2   : > { %v431_v54 = vmul.f32 %v421_v48, %v421_v48 }
  0xc3   : > { %v395_v52 = vpop.f32.mrf.mxu2  ;;  %v424_v53 = vadd.f32 %v423_v49, %v421_v48  ;;  %v433_v55 = vadd.f32 %v432_v51, %v430_v50 }
  0xc4   : > { %v408_v56 = vpop.f32.mrf.mxu3 }
  0xc5   : > { %425 = vadd.xlane.f32.xlu0 %v424_v53  ;;  %v434_v57 = vadd.f32 %v433_v55, %v431_v54 }
  0xc7   : > { %435 = vadd.xlane.f32.xlu1 %v434_v57 }
 0x138   : > { %v426_v58 = vpop.xlane.xlu0 %425 }
 0x139   : > { %v427_v59 = vmul.f32 0.001953125, %v426_v58 }
 0x13a   : > { %v436_v60 = vpop.xlane.xlu1 %435 }
 0x13b   : > { %v437_v61 = vmul.f32 0.001953125, %v436_v60  ;;  %v438_v62 = vmul.f32 %v427_v59, %v427_v59  ;;  %v441_v8 = vsub.f32 %v418_v34, %v427_v59  ;;  %v442_v9 = vsub.f32 %v419_v35, %v427_v59 }
 0x13c   : > { %v443_v10 = vsub.f32 %v420_v47, %v427_v59  ;;  %v444_v11 = vsub.f32 %v421_v48, %v427_v59 }
 0x13d   : > { %v439_v63 = vsub.f32 %v437_v61, %v438_v62 }
 0x13f   : > { %v440_v0 = vmax.f32 %v439_v63, 0.0 }
 0x141   : > { %v445_v1 = vadd.f32 1e-05, %v440_v0 }
 0x143   : > { %738 = vrsqrt.f32 %v445_v1  ;;  %vm452_vm7 = vweird.f32 %v445_v1 }
 0x149   : > { %v739_v2 = vpop.eup %738 }
 0x14a   : > { %v447_v3 = vmul.f32 %v739_v2, %v445_v1  ;;  %vm453_vm6 = vweird.f32 %v739_v2 }
 0x14b   : > { %vm454_vm8 = vmor %vm452_vm7, %vm453_vm6 }
 0x14c   : > { %v448_v4 = vmul.f32 %v739_v2, %v447_v3 }
 0x14e   : > { %v449_v5 = vmul.f32 0.5, %v448_v4 }
 0x150   : > { %v450_v6 = vsub.f32 1.5, %v449_v5 }
 0x152   : > { %v451_v7 = vmul.f32 %v739_v2, %v450_v6 }
 0x154   : > { %v455_v12 = vsel %vm454_vm8, %v739_v2, %v451_v7 }
 0x155   : > { %v456_v13 = vmul.f32 %v455_v12, %v441_v8  ;;  %v457_v14 = vmul.f32 %v455_v12, %v442_v9  ;;  %v458_v15 = vmul.f32 %v455_v12, %v443_v10  ;;  %v459_v16 = vmul.f32 %v455_v12, %v444_v11 }
 0x157   : > { %460 = vst [vmem:[%s163_s17] sm:$0xff] %v456_v13 }
 0x158   : > { %461 = vst [vmem:[%s163_s17 + $0x8] sm:$0xff] %v457_v14 }
 0x159   : > { %462 = vst [vmem:[%s163_s17 + $0x10] sm:$0xff] %v458_v15 }
 0x15a   : > { %463 = vst [vmem:[%s163_s17 + $0x18] sm:$0xff] %v459_v16 }
 0x15b   : > { %767 = shalt.err (!%p764_p3)
}
 0x15c   : > { %697 = dma.vmem_to_hbm [thread:$0]  (%p863_p5), %s479_s16, 512, %s481_s19, %s465_s20  }
 0x15d PF: > { %p703_p4 = scmp.ge.s32.totalorder %s802_s15, 2  ;;  %s492_s4 = sand.u32 1, %s790_s12  }
 0x15e   : > { %s493_s5 = scalar_lea.sflag [#allocation3], %s492_s4 }
 0x15f   : > { %p700_p7 = pnand %p703_p4, %p867_p6 }
 0x161   : > { %p701_p8 = pneg %p700_p7 }
 0x163   : > { %785 = dma.done.wait (%p701_p8), %s493_s5, 512  }
 0x164   : > { %787 = vsyncadd (%p701_p8), %s493_s5, 4294966784  ;;  %p13_p9 = scmp.ge.s32.totalorder %s850_s18, 4   ;;  %s984_s12 = smov %s794_s13 }
 0x165   : > { %s985_s13 = smov %s798_s14  ;;  %s986_s14 = smov %s861_s21 }
 0x166   : > { %s987_s15 = smov %s850_s18  ;;  %15 = sbr.rel (!%p13_p9) target bundleno = 3 (0x3), region = 67 }
 0x16b   :  { %499 = vsyncpa [#allocation3], 1 }
 0x16c   :  { %501 = vsyncpa [#allocation3 + $0x1], 1 }

</bundles_post_ra>
